<compile_context>
chip_gen: v6e
topology: v6e:2x2x1
jax: 0.10.0
libtpu: 0.0.40
codegen_flags: <defaults>
</compile_context>

<pallas_src>
import jax
import jax.numpy as jnp
from jax.experimental import pallas as pl
from jax.experimental.pallas import tpu as pltpu


def _round_up(x, m):
    return ((x + m - 1) // m) * m


def _cdiv(a, b):
    return (a + b - 1) // b


# Static row offsets of each weight/bias inside the packed 128-wide slab.
_W2, _W3A, _W3B, _W4, _W5, _W6 = 0, 256, 384, 896, 1024, 1152
_B2, _B3, _B4, _B5, _B6 = 1280, 1281, 1282, 1283, 1284
_NARROW_ROWS = 1296          # 1285 used rows, padded to a multiple of 16
_WIDE_ROWS = 528             # 513 used rows, padded to a multiple of 16


# ---------------------------------------------------------------------------
# Pallas kernel: fused (folded-upConv) mlp1..mlp6 chain over a tile of rows
# ---------------------------------------------------------------------------
def seed_mlp_kernel(naff_ref, wide_ref, narrow_ref, out_ref):
    f32 = jnp.float32
    bf16 = jnp.bfloat16

    def dot(a, b):
        # bf16 x bf16 inputs, f32 accumulation on the MXU
        return jnp.dot(a, b, preferred_element_type=f32)

    naff = naff_ref[...]                                          # (tm, 512) bf16

    # folded upConv(512->128) + concat + mlp1  ==  naff @ W1_eff + b1_eff
    w1 = wide_ref[0:512, :]                                       # (512, 256) bf16
    b1 = wide_ref[512:513, :].astype(f32)                         # (1, 256)
    h1 = jnp.maximum(dot(naff, w1) + b1, 0.0).astype(bf16)        # (tm, 256)

    nw = narrow_ref
    b2 = nw[_B2:_B2 + 1, :].astype(f32)
    b3 = nw[_B3:_B3 + 1, :].astype(f32)
    b4 = nw[_B4:_B4 + 1, :].astype(f32)
    b5 = nw[_B5:_B5 + 1, :].astype(f32)
    b6 = nw[_B6:_B6 + 1, :].astype(f32)

    # mlp2 (256 -> 128)
    h2 = jnp.maximum(dot(h1, nw[_W2:_W2 + 256, :]) + b2, 0.0).astype(bf16)
    # mlp3 on concat([h2, naff])  ==  h2 @ W3[:128] + naff @ W3[128:]
    h3 = jnp.maximum(dot(h2, nw[_W3A:_W3A + 128, :])
                     + dot(naff, nw[_W3B:_W3B + 512, :]) + b3, 0.0).astype(bf16)
    # mlp4 (128 -> 128)
    h4 = jnp.maximum(dot(h3, nw[_W4:_W4 + 128, :]) + b4, 0.0).astype(bf16)
    # mlp5 (128 -> 64, zero-padded to 128 lanes so h5 is lane-dense)
    h5 = jnp.maximum(dot(h4, nw[_W5:_W5 + 128, :]) + b5, 0.0).astype(bf16)
    # mlp6 (64 -> 3, zero-padded to a 128x128 projection; cols 3.. are zero)
    out = dot(h5, nw[_W6:_W6 + 128, :]) + b6                      # (tm, 128) f32
    out_ref[...] = out.astype(out_ref.dtype)


# ---------------------------------------------------------------------------
# One-time parameter folding + slab packing (hoisted out of the forward path)
# ---------------------------------------------------------------------------
def fold_params(p, dtype=jnp.bfloat16):
    """Exact algebraic folding + packing into two bf16 slabs.

    concat order in the PyTorch forward is [upConv_out(128), naff(512)]:
      cat([naff @ Wup + bup, naff]) @ W1 + b1
        = naff @ (Wup @ W1[:128] + W1[128:]) + (bup @ W1[:128] + b1)
    (no nonlinearity in between, so this is exact).
    """
    w1_eff = p["w_up"] @ p["w1"][:128, :] + p["w1"][128:, :]      # (512, 256)
    b1_eff = p["b_up"] @ p["w1"][:128, :] + p["b1"]               # (1, 256)

    w3a = p["w3"][:128, :]                                        # (128, 128)
    w3b = p["w3"][128:, :]                                        # (512, 128)

    # Zero-pad the tail to lane-dense 128-wide tiles (exact math).
    w5p = jnp.pad(p["w5"], ((0, 0), (0, 64)))                     # (128, 128)
    b5p = jnp.pad(p["b5"], ((0, 0), (0, 64)))                     # (1, 128)
    w6p = jnp.pad(p["w6"], ((0, 64), (0, 125)))                   # (128, 128)
    b6p = jnp.pad(p["b6"], ((0, 0), (0, 125)))                    # (1, 128)

    wide = jnp.concatenate([w1_eff, b1_eff], axis=0)              # (513, 256)
    wide = jnp.pad(wide, ((0, _WIDE_ROWS - wide.shape[0]), (0, 0)))

    narrow = jnp.concatenate(
        [p["w2"], w3a, w3b, p["w4"], w5p, w6p,
         p["b2"], p["b3"], p["b4"], b5p, b6p], axis=0)            # (1285, 128)
    narrow = jnp.pad(narrow, ((0, _NARROW_ROWS - narrow.shape[0]), (0, 0)))

    return wide.astype(dtype), narrow.astype(dtype)


# ---------------------------------------------------------------------------
# Pallas wrapper + tiny-M XLA fallback
# ---------------------------------------------------------------------------
def seed_mlp_pallas(naff, wide, narrow, *, tm_max=512):
    """naff: (M, 512) float -> (M, 3) float32 seed coordinates."""
    M = naff.shape[0]
    assert naff.shape[1] == 512

    # Row tile: as big as the data allows (amortizes per-step overhead and the
    # dependent-matmul latency), rounded to 16 for bf16 sublane packing.
    tm = min(tm_max, _round_up(max(M, 1), 16))
    # Guarantee >= 2 grid steps when there is enough work so the 'parallel'
    # axis actually shards across v7x's two TensorCores.
    if _cdiv(M, tm) < 2 and M > 16:
        tm = _round_up(_cdiv(M, 2), 16)
    Mp = _round_up(M, tm)

    x = naff.astype(jnp.bfloat16)
    if Mp != M:
        x = jnp.pad(x, ((0, Mp - M), (0, 0)))

    out = pl.pallas_call(
        seed_mlp_kernel,
        out_shape=jax.ShapeDtypeStruct((Mp, 128), jnp.bfloat16),
        grid_spec=pltpu.PrefetchScalarGridSpec(
            num_scalar_prefetch=0,
            grid=(Mp // tm,),
            in_specs=[
                pl.BlockSpec((tm, 512), lambda i: (i, 0)),
                # Whole-array, grid-invariant blocks: the two weight slabs are
                # DMA'd once and stay resident in VMEM for the whole call.
                pl.BlockSpec((_WIDE_ROWS, 256), lambda i: (0, 0)),
                pl.BlockSpec((_NARROW_ROWS, 128), lambda i: (0, 0)),
            ],
            out_specs=pl.BlockSpec((tm, 128), lambda i: (i, 0)),
        ),
        compiler_params=pltpu.CompilerParams(
            dimension_semantics=("parallel",)),
    )(x, wide, narrow)

    return out[:M, :3].astype(jnp.float32)


def _seed_mlp_xla(naff, wide, narrow):
    """Same folded chain as plain XLA dots (tiny-M path)."""
    f32 = jnp.float32
    x = naff.astype(f32)
    nw = narrow.astype(f32)
    h1 = jax.nn.relu(x @ wide[:512].astype(f32) + wide[512:513].astype(f32))
    h2 = jax.nn.relu(h1 @ nw[_W2:_W2 + 256] + nw[_B2:_B2 + 1])
    h3 = jax.nn.relu(h2 @ nw[_W3A:_W3A + 128] + x @ nw[_W3B:_W3B + 512]
                     + nw[_B3:_B3 + 1])
    h4 = jax.nn.relu(h3 @ nw[_W4:_W4 + 128] + nw[_B4:_B4 + 1])
    h5 = jax.nn.relu(h4 @ nw[_W5:_W5 + 128] + nw[_B5:_B5 + 1])
    out = h5 @ nw[_W6:_W6 + 128] + nw[_B6:_B6 + 1]
    return out[:, :3]


def seed_mlp(naff, folded, *, tm_max=512, use_pallas=None):
    wide, narrow = folded
    M = naff.shape[0]
    if use_pallas is None:
        # At tiny M a standalone custom call is pure launch + weight-DMA
        # overhead; let XLA fuse the folded chain instead.
        use_pallas = M >= 64
    if use_pallas:
        return seed_mlp_pallas(naff, wide, narrow, tm_max=tm_max)
    return _seed_mlp_xla(naff, wide, narrow)


# ---------------------------------------------------------------------------
# NoiseAwareFeatureExtractor stub (plain JAX glue)
# ---------------------------------------------------------------------------
def noise_aware_feature_extractor(x, params):
    # TODO(synk): the NoideAwareFeatureExtractor class definition was not
    # provided with the module; substituting a deterministic per-point MLP
    # (C->512) + max-pool feature head and a sigmoid confidence head with the
    # interface implied by SeedGenerator.forward: (B,512) feats, (B,N,1) conf.
    h = jax.nn.relu(jnp.einsum("bnc,cf->bnf", x, params["w_fe1"]) + params["b_fe1"])
    feats = jnp.max(h, axis=1)                                               # (B, 512)
    conf = jax.nn.sigmoid(jnp.einsum("bnf,fo->bno", h, params["w_fe2"]) + params["b_fe2"])
    return feats, conf


# ---------------------------------------------------------------------------
# Full SeedGenerator forward
# ---------------------------------------------------------------------------
def seed_generator_forward(x, params, folded, *, use_pallas=None):
    B, N, _ = x.shape
    naff_w, conf_w = noise_aware_feature_extractor(x, params)       # (B,512), (B,N,1)

    # In the PyTorch forward both concat inputs (the length-1 ConvTranspose1d
    # output linearly interpolated back to N, and layer_repeat2) are broadcasts
    # over N of the per-batch feature, so the per-point MLP output is constant
    # over N: run the chain on (B, 512) rows once and broadcast.
    seeds = seed_mlp(naff_w.astype(jnp.float32), folded, use_pallas=use_pallas)
    output = jnp.broadcast_to(seeds[:, None, :], (B, N, 3))
    return output, naff_w, conf_w


# ---------------------------------------------------------------------------
# Deterministic parameter init (shapes from SeedGenerator.__init__)
# ---------------------------------------------------------------------------
def init_params(key):
    def linear(key, fan_in, fan_out):
        kw, kb = jax.random.split(key)
        lim = 1.0 / jnp.sqrt(fan_in)
        w = jax.random.uniform(kw, (fan_in, fan_out), jnp.float32, -lim, lim)
        b = jax.random.uniform(kb, (1, fan_out), jnp.float32, -lim, lim)
        return w, b

    keys = jax.random.split(key, 9)
    p = {}
    # UpConv1D(512, 128, output_size=1) on a length-1 input == 512x128 linear
    p["w_up"], p["b_up"] = linear(keys[0], 512, 128)
    p["w1"], p["b1"] = linear(keys[1], 640, 256)   # mlp1
    p["w2"], p["b2"] = linear(keys[2], 256, 128)   # mlp2
    p["w3"], p["b3"] = linear(keys[3], 640, 128)   # mlp3
    p["w4"], p["b4"] = linear(keys[4], 128, 128)   # mlp4
    p["w5"], p["b5"] = linear(keys[5], 128, 64)    # mlp5
    p["w6"], p["b6"] = linear(keys[6], 64, 3)      # mlp6 (no activation)
    # feature-extractor stub
    p["w_fe1"], b1 = linear(keys[7], 3, 512)
    p["b_fe1"] = b1[0]
    p["w_fe2"], b2 = linear(keys[8], 512, 1)
    p["b_fe2"] = b2[0]
    return p


# pure-JAX f32 reference for the MLP chain (original, un-folded formulation)
def _reference_rows(naff, p):
    up = naff @ p["w_up"] + p["b_up"]
    feat = jnp.concatenate([up, naff], axis=-1)
    h1 = jax.nn.relu(feat @ p["w1"] + p["b1"])
    h2 = jax.nn.relu(h1 @ p["w2"] + p["b2"])
    feat2 = jnp.concatenate([h2, naff], axis=-1)
    h3 = jax.nn.relu(feat2 @ p["w3"] + p["b3"])
    h4 = jax.nn.relu(h3 @ p["w4"] + p["b4"])
    h5 = jax.nn.relu(h4 @ p["w5"] + p["b5"])
    return h5 @ p["w6"] + p["b6"]


if __name__ == "__main__":
    key = jax.random.PRNGKey(0)
    kx, kp, kn = jax.random.split(key, 3)

    B, N, C = 2, 8, 3                       # small point cloud (B, N, 3)
    x = jax.random.normal(kx, (B, N, C), jnp.float32)
    params = init_params(kp)

    # Fold/pack parameters once (hoisted out of the per-forward path).
    folded = tuple(jax.block_until_ready(w) for w in fold_params(params))

    # 1) Full module forward.  Force the Pallas path so the kernel is
    #    exercised even at this tiny batch (default dispatch would use XLA).
    output, naff_w, conf_w = seed_generator_forward(x, params, folded,
                                                    use_pallas=True)
    jax.block_until_ready((output, naff_w, conf_w))

    assert output.shape == (B, N, 3)
    assert naff_w.shape == (B, 512)
    assert conf_w.shape == (B, N, 1)

    # bf16 MXU path -> relaxed tolerance vs. the f32 un-folded reference
    ref_rows = _reference_rows(naff_w, params)                       # (B, 3)
    ref = jnp.broadcast_to(ref_rows[:, None, :], (B, N, 3))
    assert jnp.allclose(output, ref, atol=3e-2, rtol=3e-2), (
        float(jnp.max(jnp.abs(output - ref))))

    # 2) Multi-tile check: larger M exercises a >= 2-step grid (padding path,
    #    resident-weight reuse, and the v7x two-core split).
    naff_big = jax.random.normal(kn, (200, 512), jnp.float32)
    seeds_big = seed_mlp(naff_big, folded, use_pallas=True)
    jax.block_until_ready(seeds_big)
    ref_big = _reference_rows(naff_big, params)
    assert seeds_big.shape == (200, 3)
    assert jnp.allclose(seeds_big, ref_big, atol=3e-2, rtol=3e-2), (
        float(jnp.max(jnp.abs(seeds_big - ref_big))))

    print("KERNEL_OK")
</pallas_src>

<mosaic_0001>
module attributes {stable_mosaic.version = 11 : i64} {
  func.func @seed_mlp_kernel(%arg0: i32, %arg1: memref<16x512xbf16, #tpu.memory_space<vmem>>, %arg2: memref<528x256xbf16, #tpu.memory_space<vmem>>, %arg3: memref<1296x128xbf16, #tpu.memory_space<vmem>>, %arg4: memref<16x128xbf16, #tpu.memory_space<vmem>>) attributes {dimension_semantics = [#tpu.dimension_semantics<parallel>], iteration_bounds = array<i64: 1>, scalar_prefetch = 0 : i64, scratch_operands = 0 : i64, tpu.core_type = #tpu.core_type<tc>, window_params = [{transform_indices = @transform_0, window_bounds = array<i64: 16, 512>}, {pipeline_mode = #tpu.pipeline_mode<synchronous>, transform_indices = @transform_1, window_bounds = array<i64: 528, 256>}, {pipeline_mode = #tpu.pipeline_mode<synchronous>, transform_indices = @transform_2, window_bounds = array<i64: 1296, 128>}, {transform_indices = @transform_3, window_bounds = array<i64: 16, 128>}]} {
    %c0 = arith.constant 0 : index
    %c0_0 = arith.constant 0 : index
    %0 = vector.load %arg1[%c0, %c0_0] : memref<16x512xbf16, #tpu.memory_space<vmem>>, vector<16x512xbf16>
    %c0_1 = arith.constant 0 : index
    %c0_2 = arith.constant 0 : index
    %1 = vector.load %arg2[%c0_1, %c0_2] : memref<528x256xbf16, #tpu.memory_space<vmem>>, vector<512x256xbf16>
    %c512 = arith.constant 512 : index
    %c0_3 = arith.constant 0 : index
    %2 = vector.load %arg2[%c512, %c0_3] : memref<528x256xbf16, #tpu.memory_space<vmem>>, vector<1x256xbf16>
    %3 = arith.extf %2 : vector<1x256xbf16> to vector<1x256xf32>
    %cst = arith.constant dense<0.000000e+00> : vector<16x256xf32>
    %4 = tpu.matmul %0, %1, %cst {dimension_numbers = #tpu.dot_dimension_numbers<[1], [0], [0], [1], [0, 0, 1, 1], [], []>} : vector<16x512xbf16>, vector<512x256xbf16>, vector<16x256xf32> -> vector<16x256xf32>
    %5 = vector.broadcast %3 : vector<1x256xf32> to vector<16x256xf32>
    %6 = arith.addf %4, %5 : vector<16x256xf32>
    %cst_4 = arith.constant 0.000000e+00 : f32
    %7 = vector.broadcast %cst_4 : f32 to vector<16x256xf32>
    %8 = arith.maximumf %6, %7 : vector<16x256xf32>
    %9 = arith.truncf %8 : vector<16x256xf32> to vector<16x256xbf16>
    %c1280 = arith.constant 1280 : index
    %c0_5 = arith.constant 0 : index
    %10 = vector.load %arg3[%c1280, %c0_5] : memref<1296x128xbf16, #tpu.memory_space<vmem>>, vector<1x128xbf16>
    %11 = arith.extf %10 : vector<1x128xbf16> to vector<1x128xf32>
    %c1281 = arith.constant 1281 : index
    %c0_6 = arith.constant 0 : index
    %12 = vector.load %arg3[%c1281, %c0_6] : memref<1296x128xbf16, #tpu.memory_space<vmem>>, vector<1x128xbf16>
    %13 = arith.extf %12 : vector<1x128xbf16> to vector<1x128xf32>
    %c1282 = arith.constant 1282 : index
    %c0_7 = arith.constant 0 : index
    %14 = vector.load %arg3[%c1282, %c0_7] : memref<1296x128xbf16, #tpu.memory_space<vmem>>, vector<1x128xbf16>
    %15 = arith.extf %14 : vector<1x128xbf16> to vector<1x128xf32>
    %c1283 = arith.constant 1283 : index
    %c0_8 = arith.constant 0 : index
    %16 = vector.load %arg3[%c1283, %c0_8] : memref<1296x128xbf16, #tpu.memory_space<vmem>>, vector<1x128xbf16>
    %17 = arith.extf %16 : vector<1x128xbf16> to vector<1x128xf32>
    %c1284 = arith.constant 1284 : index
    %c0_9 = arith.constant 0 : index
    %18 = vector.load %arg3[%c1284, %c0_9] : memref<1296x128xbf16, #tpu.memory_space<vmem>>, vector<1x128xbf16>
    %19 = arith.extf %18 : vector<1x128xbf16> to vector<1x128xf32>
    %c0_10 = arith.constant 0 : index
    %c0_11 = arith.constant 0 : index
    %20 = vector.load %arg3[%c0_10, %c0_11] : memref<1296x128xbf16, #tpu.memory_space<vmem>>, vector<256x128xbf16>
    %cst_12 = arith.constant dense<0.000000e+00> : vector<16x128xf32>
    %21 = tpu.matmul %9, %20, %cst_12 {dimension_numbers = #tpu.dot_dimension_numbers<[1], [0], [0], [1], [0, 0, 1, 1], [], []>} : vector<16x256xbf16>, vector<256x128xbf16>, vector<16x128xf32> -> vector<16x128xf32>
    %22 = vector.broadcast %11 : vector<1x128xf32> to vector<16x128xf32>
    %23 = arith.addf %21, %22 : vector<16x128xf32>
    %cst_13 = arith.constant 0.000000e+00 : f32
    %24 = vector.broadcast %cst_13 : f32 to vector<16x128xf32>
    %25 = arith.maximumf %23, %24 : vector<16x128xf32>
    %26 = arith.truncf %25 : vector<16x128xf32> to vector<16x128xbf16>
    %c256 = arith.constant 256 : index
    %c0_14 = arith.constant 0 : index
    %27 = vector.load %arg3[%c256, %c0_14] : memref<1296x128xbf16, #tpu.memory_space<vmem>>, vector<128x128xbf16>
    %cst_15 = arith.constant dense<0.000000e+00> : vector<16x128xf32>
    %28 = tpu.matmul %26, %27, %cst_15 {dimension_numbers = #tpu.dot_dimension_numbers<[1], [0], [0], [1], [0, 0, 1, 1], [], []>} : vector<16x128xbf16>, vector<128x128xbf16>, vector<16x128xf32> -> vector<16x128xf32>
    %c384 = arith.constant 384 : index
    %c0_16 = arith.constant 0 : index
    %29 = vector.load %arg3[%c384, %c0_16] : memref<1296x128xbf16, #tpu.memory_space<vmem>>, vector<512x128xbf16>
    %cst_17 = arith.constant dense<0.000000e+00> : vector<16x128xf32>
    %30 = tpu.matmul %0, %29, %cst_17 {dimension_numbers = #tpu.dot_dimension_numbers<[1], [0], [0], [1], [0, 0, 1, 1], [], []>} : vector<16x512xbf16>, vector<512x128xbf16>, vector<16x128xf32> -> vector<16x128xf32>
    %31 = arith.addf %28, %30 : vector<16x128xf32>
    %32 = vector.broadcast %13 : vector<1x128xf32> to vector<16x128xf32>
    %33 = arith.addf %31, %32 : vector<16x128xf32>
    %cst_18 = arith.constant 0.000000e+00 : f32
    %34 = vector.broadcast %cst_18 : f32 to vector<16x128xf32>
    %35 = arith.maximumf %33, %34 : vector<16x128xf32>
    %36 = arith.truncf %35 : vector<16x128xf32> to vector<16x128xbf16>
    %c896 = arith.constant 896 : index
    %c0_19 = arith.constant 0 : index
    %37 = vector.load %arg3[%c896, %c0_19] : memref<1296x128xbf16, #tpu.memory_space<vmem>>, vector<128x128xbf16>
    %cst_20 = arith.constant dense<0.000000e+00> : vector<16x128xf32>
    %38 = tpu.matmul %36, %37, %cst_20 {dimension_numbers = #tpu.dot_dimension_numbers<[1], [0], [0], [1], [0, 0, 1, 1], [], []>} : vector<16x128xbf16>, vector<128x128xbf16>, vector<16x128xf32> -> vector<16x128xf32>
    %39 = vector.broadcast %15 : vector<1x128xf32> to vector<16x128xf32>
    %40 = arith.addf %38, %39 : vector<16x128xf32>
    %cst_21 = arith.constant 0.000000e+00 : f32
    %41 = vector.broadcast %cst_21 : f32 to vector<16x128xf32>
    %42 = arith.maximumf %40, %41 : vector<16x128xf32>
    %43 = arith.truncf %42 : vector<16x128xf32> to vector<16x128xbf16>
    %c1024 = arith.constant 1024 : index
    %c0_22 = arith.constant 0 : index
    %44 = vector.load %arg3[%c1024, %c0_22] : memref<1296x128xbf16, #tpu.memory_space<vmem>>, vector<128x128xbf16>
    %cst_23 = arith.constant dense<0.000000e+00> : vector<16x128xf32>
    %45 = tpu.matmul %43, %44, %cst_23 {dimension_numbers = #tpu.dot_dimension_numbers<[1], [0], [0], [1], [0, 0, 1, 1], [], []>} : vector<16x128xbf16>, vector<128x128xbf16>, vector<16x128xf32> -> vector<16x128xf32>
    %46 = vector.broadcast %17 : vector<1x128xf32> to vector<16x128xf32>
    %47 = arith.addf %45, %46 : vector<16x128xf32>
    %cst_24 = arith.constant 0.000000e+00 : f32
    %48 = vector.broadcast %cst_24 : f32 to vector<16x128xf32>
    %49 = arith.maximumf %47, %48 : vector<16x128xf32>
    %50 = arith.truncf %49 : vector<16x128xf32> to vector<16x128xbf16>
    %c1152 = arith.constant 1152 : index
    %c0_25 = arith.constant 0 : index
    %51 = vector.load %arg3[%c1152, %c0_25] : memref<1296x128xbf16, #tpu.memory_space<vmem>>, vector<128x128xbf16>
    %cst_26 = arith.constant dense<0.000000e+00> : vector<16x128xf32>
    %52 = tpu.matmul %50, %51, %cst_26 {dimension_numbers = #tpu.dot_dimension_numbers<[1], [0], [0], [1], [0, 0, 1, 1], [], []>} : vector<16x128xbf16>, vector<128x128xbf16>, vector<16x128xf32> -> vector<16x128xf32>
    %53 = vector.broadcast %19 : vector<1x128xf32> to vector<16x128xf32>
    %54 = arith.addf %52, %53 : vector<16x128xf32>
    %55 = arith.truncf %54 : vector<16x128xf32> to vector<16x128xbf16>
    %c0_27 = arith.constant 0 : index
    %c0_28 = arith.constant 0 : index
    %56 = vector.load %arg4[%c0_27, %c0_28] : memref<16x128xbf16, #tpu.memory_space<vmem>>, vector<16x128xbf16>
    tpu.vector_store %arg4[%c0_27, %c0_28], %55 {strides = array<i32>} : memref<16x128xbf16, #tpu.memory_space<vmem>>, vector<16x128xbf16>,
    return
  }
  func.func @transform_0(%arg0: i32) -> (i32, i32) {
    %c0_i32 = arith.constant 0 : i32
    %c0_i32_0 = arith.constant 0 : i32
    return %arg0, %c0_i32 : i32, i32
  }
  func.func @transform_1(%arg0: i32) -> (i32, i32) {
    %c0_i32 = arith.constant 0 : i32
    %c0_i32_0 = arith.constant 0 : i32
    %c0_i32_1 = arith.constant 0 : i32
    return %c0_i32, %c0_i32_0 : i32, i32
  }
  func.func @transform_2(%arg0: i32) -> (i32, i32) {
    %c0_i32 = arith.constant 0 : i32
    %c0_i32_0 = arith.constant 0 : i32
    %c0_i32_1 = arith.constant 0 : i32
    return %c0_i32, %c0_i32_0 : i32, i32
  }
  func.func @transform_3(%arg0: i32) -> (i32, i32) {
    %c0_i32 = arith.constant 0 : i32
    %c0_i32_0 = arith.constant 0 : i32
    return %arg0, %c0_i32 : i32, i32
  }
}

</mosaic_0001>

<bundles_post_ra>
// kernel: tpu_custom_call.1
= control target key start
LH: loop header
LB: loop body
LE: loop exit
PB: predicated region body
PF: predicated region fallthrough
CT: control target
= control target key end

     0   :  { %8 = vsyncpa [#allocation3], 0  ;;  %s2296_s0 = inlined_call_operand.hbm [shape: bf16[16,512], index: 0, kind: input, shape index: {}]   ;;  %s2297_s1 = inlined_call_operand.hbm [shape: bf16[528,256], index: 1, kind: input, shape index: {}]   ;;  %s2298_s2 = inlined_call_operand.hbm [shape: bf16[1296,128], index: 2, kind: input, shape index: {}]   ;;  %s2299_s3 = inlined_call_operand.hbm [shape: bf16[16,128], index: 3, kind: output, shape index: {}]  }
   0x1   :  { %9 = vsyncpa [#allocation6], 0 }
   0x2   :  { %10 = vsyncpa [#allocation4], 0  ;;  %s2182_s12 = smov [#allocation5]  }
   0x3   :  { %s28_s13 = sshll.u32 %s2182_s12, 4  ;;  %s29_s13 = int_to_ptr.vmem [resolvable:$true] %s28_s13 }
   0x4   :  { %s2104_s14 = scalar_lea.vmem %s29_s13, 8448  ;;  %p2109_p1 = scmp.lt.s32.totalorder %s29_s13, %s29_s13 }
   0x5   :  { %p2105_p0 = scmp.ne.s32.totalorder %s29_s13, %s2104_s14  ;;  %p2110_p2 = scmp.lt.s32.totalorder %s2104_s14, %s2104_s14 }
   0x7   :  { %p2111_p3 = por %p2110_p2, %p2109_p1 }
   0x9   :  { %p2112_p4 = pnand %p2111_p3, %p2105_p0 }
   0xb   :  { %2115 = shalt.err (!%p2112_p4)
}
   0xc   :  { %s2183_s15 = smov 128   ;;  %s2184_s16 = smov 8  }
   0xd   :  { %34 = dma.hbm_to_vmem [thread:$0]  %s2297_s1, 8448, %s29_s13, [#allocation6], %s2183_s15, %s2183_s15, %s2184_s16  }
   0xe   :  { %s2185_s19 = smov [#allocation2]  }
   0xf   :  { %s16_s20 = sshll.u32 %s2185_s19, 4  ;;  %s17_s20 = int_to_ptr.vmem [resolvable:$true] %s16_s20 }
  0x10   :  { %s2124_s21 = scalar_lea.vmem %s17_s20, 512  ;;  %p2129_p6 = scmp.lt.s32.totalorder %s17_s20, %s17_s20 }
  0x11   :  { %p2125_p5 = scmp.ne.s32.totalorder %s17_s20, %s2124_s21  ;;  %p2130_p7 = scmp.lt.s32.totalorder %s2124_s21, %s2124_s21 }
  0x13   :  { %p2131_p8 = por %p2130_p7, %p2129_p6 }
  0x15   :  { %p2132_p9 = pnand %p2131_p8, %p2125_p5 }
  0x17   :  { %2135 = shalt.err (!%p2132_p9)
}
  0x18   :  { %s2186_s22 = smov 256   ;;  %s2187_s23 = smov 16  }
  0x19   :  { %22 = dma.hbm_to_vmem [thread:$0]  %s2296_s0, 512, %s17_s20, [#allocation3], %s2186_s22, %s2186_s22, %s2187_s23  }
  0x1a   :  { %s2188_s26 = smov [#allocation7]  }
  0x1b   :  { %s40_s27 = sshll.u32 %s2188_s26, 4  ;;  %s41_s27 = int_to_ptr.vmem [resolvable:$true] %s40_s27 }
  0x1c   :  { %s2144_s1 = scalar_lea.vmem %s41_s27, 10368  ;;  %p2149_p11 = scmp.lt.s32.totalorder %s41_s27, %s41_s27 }
  0x1d   :  { %p2145_p10 = scmp.ne.s32.totalorder %s41_s27, %s2144_s1  ;;  %p2150_p12 = scmp.lt.s32.totalorder %s2144_s1, %s2144_s1 }
  0x1f   :  { %p2151_p13 = por %p2150_p12, %p2149_p11 }
  0x21   :  { %p2152_p0 = pnand %p2151_p13, %p2145_p10 }
  0x23   :  { %2155 = shalt.err (!%p2152_p0)
}
  0x24   :  { %s2189_s28 = smov 64   ;;  %s2190_s29 = smov 4  }
  0x25   :  { %46 = dma.hbm_to_vmem [thread:$0]  %s2298_s2, 10368, %s41_s27, [#allocation6], %s2189_s28, %s2189_s28, %s2190_s29  }
  0x26   :  { %2176 = dma.done.wait [#allocation3], 512  }
  0x27   :  { %2177 = vsyncadd [#allocation3], 4294966784 }
  0x28   :  { %2178 = dma.done.wait [#allocation6], 18816  }
  0x29   :  { %2179 = vsyncadd [#allocation6], 4294948480  ;;  %v1914_v0 = vld [vmem:[#allocation5 + $0x74] ss:$8 sps:$4 sm:$0xff]   ;;  %v1918_v2 = vld [vmem:[#allocation5 + $0x70] ss:$8 sps:$4 sm:$0xff]  }
  0x2a   :  { %v1916_v1 = vld [vmem:[#allocation5 + $0x174] ss:$8 sps:$4 sm:$0xff]   ;;  %476 = vmatprep.subr.bf16.mxu0 %v1914_v0  ;;  %v1919_v3 = vld [vmem:[#allocation5 + $0x170] ss:$8 sps:$4 sm:$0xff]   ;;  %v1920_v4 = vld [vmem:[#allocation5 + $0x64] ss:$8 sps:$4 sm:$0xff]  }
  0x2b   :  { %519 = vmatprep.subr.bf16.mxu1 %v1916_v1  ;;  %477 = vmatpush1.bf16.msra.mxu0 %v1918_v2  ;;  %v1922_v5 = vld [vmem:[#allocation5 + $0x164] ss:$8 sps:$4 sm:$0xff]   ;;  %v1924_v6 = vld [vmem:[#allocation5 + $0x60] ss:$8 sps:$4 sm:$0xff]   ;;  %v1926_v8 = vld [vmem:[#allocation5 + $0x54] ss:$8 sps:$4 sm:$0xff]  }
  0x2c   :  { %520 = vmatpush1.bf16.msra.mxu1 %v1919_v3  ;;  %478 = vmatprep.subr.bf16.mxu0 %v1920_v4  ;;  %v1925_v7 = vld [vmem:[#allocation5 + $0x160] ss:$8 sps:$4 sm:$0xff]   ;;  %v1928_v9 = vld [vmem:[#allocation5 + $0x154] ss:$8 sps:$4 sm:$0xff]   ;;  %v1930_v10 = vld [vmem:[#allocation5 + $0x50] ss:$8 sps:$4 sm:$0xff]  }
  0x2d   :  { %521 = vmatprep.subr.bf16.mxu1 %v1922_v5  ;;  %v1931_v11 = vld [vmem:[#allocation5 + $0x150] ss:$8 sps:$4 sm:$0xff]   ;;  %v1932_v12 = vld [vmem:[#allocation5 + $0x44] ss:$8 sps:$4 sm:$0xff]   ;;  %v1936_v14 = vld [vmem:[#allocation5 + $0x40] ss:$8 sps:$4 sm:$0xff]  }
  0x2e   :  { %v1934_v13 = vld [vmem:[#allocation5 + $0x144] ss:$8 sps:$4 sm:$0xff]   ;;  %v1937_v15 = vld [vmem:[#allocation5 + $0x140] ss:$8 sps:$4 sm:$0xff]   ;;  %v1938_v16 = vld [vmem:[#allocation5 + $0x34] ss:$8 sps:$4 sm:$0xff]  }
  0x2f   :  { %479 = vmatpush1.bf16.msra.mxu0 %v1924_v6  ;;  %v1940_v17 = vld [vmem:[#allocation5 + $0x134] ss:$8 sps:$4 sm:$0xff]   ;;  %v1942_v18 = vld [vmem:[#allocation5 + $0x30] ss:$8 sps:$4 sm:$0xff]   ;;  %v1944_v20 = vld [vmem:[#allocation5 + $0x24] ss:$8 sps:$4 sm:$0xff]  }
  0x30   :  { %522 = vmatpush1.bf16.msra.mxu1 %v1925_v7  ;;  %480 = vmatprep.subr.bf16.mxu0 %v1926_v8  ;;  %v1943_v19 = vld [vmem:[#allocation5 + $0x130] ss:$8 sps:$4 sm:$0xff]   ;;  %v1946_v21 = vld [vmem:[#allocation5 + $0x124] ss:$8 sps:$4 sm:$0xff]   ;;  %v1948_v22 = vld [vmem:[#allocation5 + $0x20] ss:$8 sps:$4 sm:$0xff]  }
  0x31   :  { %523 = vmatprep.subr.bf16.mxu1 %v1928_v9  ;;  %v1949_v23 = vld [vmem:[#allocation5 + $0x120] ss:$8 sps:$4 sm:$0xff]   ;;  %v1950_v24 = vld [vmem:[#allocation5 + $0x14] ss:$8 sps:$4 sm:$0xff]   ;;  %v1954_v26 = vld [vmem:[#allocation5 + $0x10] ss:$8 sps:$4 sm:$0xff]  }
  0x32   :  { %v1952_v25 = vld [vmem:[#allocation5 + $0x114] ss:$8 sps:$4 sm:$0xff]   ;;  %v1955_v27 = vld [vmem:[#allocation5 + $0x110] ss:$8 sps:$4 sm:$0xff]   ;;  %v1956_v28 = vld [vmem:[#allocation5 + $0x4] ss:$8 sps:$4 sm:$0xff]  }
  0x33   :  { %481 = vmatpush1.bf16.msra.mxu0 %v1930_v10  ;;  %v1958_v29 = vld [vmem:[#allocation5 + $0x104] ss:$8 sps:$4 sm:$0xff]   ;;  %v1960_v30 = vld [vmem:[#allocation5] ss:$8 sps:$4 sm:$0xff]   ;;  %v1962_v32 = vld [vmem:[#allocation5 + $0xf4] ss:$8 sps:$4 sm:$0xff]  }
  0x34   :  { %524 = vmatpush1.bf16.msra.mxu1 %v1931_v11  ;;  %482 = vmatprep.subr.bf16.mxu0 %v1932_v12  ;;  %v1961_v31 = vld [vmem:[#allocation5 + $0x100] ss:$8 sps:$4 sm:$0xff]   ;;  %v1964_v33 = vld [vmem:[#allocation5 + $0x1f4] ss:$8 sps:$4 sm:$0xff]   ;;  %v1966_v34 = vld [vmem:[#allocation5 + $0xf0] ss:$8 sps:$4 sm:$0xff]  }
  0x35   :  { %525 = vmatprep.subr.bf16.mxu1 %v1934_v13  ;;  %v1967_v35 = vld [vmem:[#allocation5 + $0x1f0] ss:$8 sps:$4 sm:$0xff]   ;;  %v1968_v36 = vld [vmem:[#allocation5 + $0xe4] ss:$8 sps:$4 sm:$0xff]   ;;  %v1972_v38 = vld [vmem:[#allocation5 + $0xe0] ss:$8 sps:$4 sm:$0xff]  }
  0x36   :  { %v1970_v37 = vld [vmem:[#allocation5 + $0x1e4] ss:$8 sps:$4 sm:$0xff]   ;;  %v1973_v39 = vld [vmem:[#allocation5 + $0x1e0] ss:$8 sps:$4 sm:$0xff]   ;;  %v1974_v40 = vld [vmem:[#allocation5 + $0xd4] ss:$8 sps:$4 sm:$0xff]  }
  0x37   :  { %483 = vmatpush1.bf16.msra.mxu0 %v1936_v14  ;;  %v1976_v41 = vld [vmem:[#allocation5 + $0x1d4] ss:$8 sps:$4 sm:$0xff]   ;;  %v1978_v42 = vld [vmem:[#allocation5 + $0xd0] ss:$8 sps:$4 sm:$0xff]   ;;  %v1980_v44 = vld [vmem:[#allocation5 + $0xc4] ss:$8 sps:$4 sm:$0xff]  }
  0x38   :  { %526 = vmatpush1.bf16.msra.mxu1 %v1937_v15  ;;  %484 = vmatprep.subr.bf16.mxu0 %v1938_v16  ;;  %v1979_v43 = vld [vmem:[#allocation5 + $0x1d0] ss:$8 sps:$4 sm:$0xff]   ;;  %v1982_v45 = vld [vmem:[#allocation5 + $0x1c4] ss:$8 sps:$4 sm:$0xff]   ;;  %v1984_v46 = vld [vmem:[#allocation5 + $0xc0] ss:$8 sps:$4 sm:$0xff]  }
  0x39   :  { %527 = vmatprep.subr.bf16.mxu1 %v1940_v17  ;;  %v1985_v47 = vld [vmem:[#allocation5 + $0x1c0] ss:$8 sps:$4 sm:$0xff]   ;;  %v1986_v48 = vld [vmem:[#allocation5 + $0xb4] ss:$8 sps:$4 sm:$0xff]   ;;  %v1990_v52 = vld [vmem:[#allocation5 + $0xb0] ss:$8 sps:$4 sm:$0xff]  }
  0x3a   :  { %v2012_v49 = vld [vmem:[#allocation2 + $0x4] ss:$16 sps:$4 sm:$0xff]   ;;  %v2226_v51 = vld [vmem:[#allocation2 + $0xc] ss:$16 sps:$4 sm:$0xff]   ;;  %v1991_v53 = vld [vmem:[#allocation5 + $0x1b0] ss:$8 sps:$4 sm:$0xff]  }
  0x3b   :  { %485 = vmatpush1.bf16.msra.mxu0 %v1942_v18  ;;  %v1988_v50 = vld [vmem:[#allocation5 + $0x1b4] ss:$8 sps:$4 sm:$0xff]   ;;  %508 = vmatprep.mubr.bf16.mxu0 %v2012_v49  ;;  %v1992_v54 = vld [vmem:[#allocation5 + $0xa4] ss:$8 sps:$4 sm:$0xff]   ;;  %v1996_v56 = vld [vmem:[#allocation5 + $0xa0] ss:$8 sps:$4 sm:$0xff]  }
  0x3c   :  { %528 = vmatpush1.bf16.msra.mxu1 %v1943_v19  ;;  %486 = vmatprep.subr.bf16.mxu0 %v1944_v20  ;;  %v1994_v55 = vld [vmem:[#allocation5 + $0x1a4] ss:$8 sps:$4 sm:$0xff]   ;;  %v1997_v57 = vld [vmem:[#allocation5 + $0x1a0] ss:$8 sps:$4 sm:$0xff]   ;;  %v1998_v58 = vld [vmem:[#allocation5 + $0x94] ss:$8 sps:$4 sm:$0xff]  }
  0x3d   :  { %529 = vmatprep.subr.bf16.mxu1 %v1946_v21  ;;  %551 = vmatprep.mubr.bf16.mxu1 %v2226_v51  ;;  %v2000_v59 = vld [vmem:[#allocation5 + $0x194] ss:$8 sps:$4 sm:$0xff]   ;;  %v2002_v60 = vld [vmem:[#allocation5 + $0x90] ss:$8 sps:$4 sm:$0xff]   ;;  %v2004_v62 = vld [vmem:[#allocation5 + $0x84] ss:$8 sps:$4 sm:$0xff]  }
  0x3e   :  { %v2003_v61 = vld [vmem:[#allocation5 + $0x190] ss:$8 sps:$4 sm:$0xff]   ;;  %v2006_v63 = vld [vmem:[#allocation5 + $0x184] ss:$8 sps:$4 sm:$0xff]   ;;  %v2008_v0 = vld [vmem:[#allocation5 + $0x80] ss:$8 sps:$4 sm:$0xff]  }
  0x3f   :  { %487 = vmatpush1.bf16.msra.mxu0 %v1948_v22  ;;  %v2009_v1 = vld [vmem:[#allocation5 + $0x180] ss:$8 sps:$4 sm:$0xff]   ;;  %v2020_v8 = vld [vmem:[#allocation7 + $0x68] sm:$0xff]   ;;  %v2022_v10 = vld [vmem:[#allocation7 + $0x60] sm:$0xff]   ;;  %vm2192_vm0 = vmmov 0   ;;  %s2193_s0 = smov [#allocation8]  }
  0x40   :  { %530 = vmatpush1.bf16.msra.mxu1 %v1949_v23  ;;  %488 = vmatprep.subr.bf16.mxu0 %v1950_v24  ;;  %v2016_v2 = vld [vmem:[#allocation7 + $0x78] sm:$0xff]   ;;  %v2229_v3 = vld [vmem:[#allocation2] ss:$16 sps:$4 sm:$0xff]   ;;  %v2021_v9 = vld [vmem:[#allocation7 + $0x28] sm:$0xff]   ;;  %s1550_s2 = sshll.u32 %s2193_s0, 4  ;;  %s1551_s2 = int_to_ptr.vmem [resolvable:$true] %s1550_s2 }
  0x41   :  { %531 = vmatprep.subr.bf16.mxu1 %v1952_v25  ;;  %v2231_v4 = vld [vmem:[#allocation2 + $0x8] ss:$16 sps:$4 sm:$0xff]   ;;  %v2018_v6 = vld [vmem:[#allocation7 + $0x70] sm:$0xff]   ;;  %v2023_v11 = vld [vmem:[#allocation7 + $0x20] sm:$0xff]   ;;  %s2156_s5 = scalar_lea.vmem %s1551_s2, 128  ;;  %p2161_p2 = scmp.lt.s32.totalorder %s1551_s2, %s1551_s2 }
  0x42   :  { %v2017_v5 = vld [vmem:[#allocation7 + $0x38] sm:$0xff]   ;;  %v2019_v7 = vld [vmem:[#allocation7 + $0x30] sm:$0xff]   ;;  %v2028_v16 = vld [vmem:[#allocation7 + $0x48] sm:$0xff]   ;;  %p2157_p1 = scmp.ne.s32.totalorder %s1551_s2, %s2156_s5  ;;  %p2162_p3 = scmp.lt.s32.totalorder %s2156_s5, %s2156_s5 }
  0x43   :  { %489 = vmatpush1.bf16.msra.mxu0 %v1954_v26  ;;  %v2024_v12 = vld [vmem:[#allocation7 + $0x58] sm:$0xff]   ;;  %v2026_v14 = vld [vmem:[#allocation7 + $0x50] sm:$0xff]   ;;  %v2029_v17 = vld [vmem:[#allocation7 + $0x8] sm:$0xff]  }
  0x44   :  { %532 = vmatpush1.bf16.msra.mxu1 %v1955_v27  ;;  %490 = vmatprep.subr.bf16.mxu0 %v1956_v28  ;;  %v2025_v13 = vld [vmem:[#allocation7 + $0x18] sm:$0xff]   ;;  %v2027_v15 = vld [vmem:[#allocation7 + $0x10] sm:$0xff]   ;;  %v2030_v18 = vld [vmem:[#allocation7 + $0x40] sm:$0xff]   ;;  %p2163_p4 = por %p2162_p3, %p2161_p2 }
  0x45   :  { %533 = vmatprep.subr.bf16.mxu1 %v1958_v29  ;;  %v2031_v19 = vld [vmem:[#allocation7] sm:$0xff]   ;;  %v2032_v20 = vld [vmem:[#allocation7 + $0x138] sm:$0xff]   ;;  %v2036_v23 = vld [vmem:[#allocation7 + $0x130] sm:$0xff]  }
  0x46   :  { %v2033_v21 = vld [vmem:[#allocation7 + $0x1b8] sm:$0xff]   ;;  %v2038_v24 = vld [vmem:[#allocation7 + $0xf0] sm:$0xff]   ;;  %v2040_v25 = vld [vmem:[#allocation7 + $0x128] sm:$0xff]   ;;  %p2164_p5 = pnand %p2163_p4, %p2157_p1 }
  0x47   :  { %491 = vmatpush1.bf16.msra.mxu0 %v1960_v30  ;;  %v2034_v22 = vld [vmem:[#allocation7 + $0xf8] sm:$0xff]   ;;  %v2042_v26 = vld [vmem:[#allocation7 + $0xe8] sm:$0xff]   ;;  %v2044_v27 = vld [vmem:[#allocation7 + $0x120] sm:$0xff]  }
  0x48   :  { %534 = vmatpush1.bf16.msra.mxu1 %v1961_v31  ;;  %492 = vmatprep.subr.bf16.mxu0 %v1962_v32  ;;  %v2046_v28 = vld [vmem:[#allocation7 + $0xe0] sm:$0xff]   ;;  %v2048_v29 = vld [vmem:[#allocation7 + $0x118] sm:$0xff]   ;;  %v2052_v31 = vld [vmem:[#allocation7 + $0x110] sm:$0xff]  }
  0x49   :  { %535 = vmatprep.subr.bf16.mxu1 %v1964_v33  ;;  %v2050_v30 = vld [vmem:[#allocation7 + $0xd8] sm:$0xff]   ;;  %v2054_v32 = vld [vmem:[#allocation7 + $0xd0] sm:$0xff]   ;;  %v2056_v33 = vld [vmem:[#allocation7 + $0x108] sm:$0xff]  }
  0x4b   :  { %493 = vmatpush2.bf16.msra.mxu0 %v1966_v34  ;;  %v2058_v34 = vld [vmem:[#allocation7 + $0xc8] sm:$0xff]  }
  0x4c   :  { %536 = vmatpush2.bf16.msra.mxu1 %v1967_v35  ;;  %494 = vmatprep.subr.bf16.mxu0 %v1968_v36  ;;  %v2060_v35 = vld [vmem:[#allocation7 + $0x100] sm:$0xff]  }
  0x4d   :  { %537 = vmatprep.subr.bf16.mxu1 %v1970_v37  ;;  %v2062_v36 = vld [vmem:[#allocation7 + $0xc0] sm:$0xff]   ;;  %v2064_v37 = vld [vmem:[#allocation7 + $0xb8] sm:$0xff]  }
  0x4f   :  { %495 = vmatpush2.bf16.msra.mxu0 %v1972_v38  ;;  %v2191_v38 = vmov 0.0  }
  0x50   :  { %538 = vmatpush2.bf16.msra.mxu1 %v1973_v39  ;;  %496 = vmatprep.subr.bf16.mxu0 %v1974_v40  ;;  %v2065_v39 = vld [vmem:[#allocation7 + $0xb0] sm:$0xff]   ;;  %v2066_v40 = vld [vmem:[#allocation7 + $0xa8] sm:$0xff]  }
  0x51   :  { %539 = vmatprep.subr.bf16.mxu1 %v1976_v41  ;;  %v2067_v41 = vld [vmem:[#allocation7 + $0xa0] sm:$0xff]  }
  0x53   :  { %497 = vmatpush2.bf16.msra.mxu0 %v1978_v42  ;;  %v128_v42 = vlaneseq }
  0x54   :  { %540 = vmatpush2.bf16.msra.mxu1 %v1979_v43  ;;  %498 = vmatprep.subr.bf16.mxu0 %v1980_v44  ;;  %v125_v44 = vld [vmem:[#allocation5 + $0x200] sm:$0x11] }
  0x55   :  { %541 = vmatprep.subr.bf16.mxu1 %v1982_v45  ;;  %v2241_v43 = vshrl.u32 %v128_v42, 7  ;;  %v127_v45 = vunpack.c.h.bf16 %v125_v44 }
  0x57   :  { %499 = vmatpush2.bf16.msra.mxu0 %v1984_v46  ;;  %v126_v46 = vunpack.c.l.bf16 %v125_v44 }
  0x58   :  { %542 = vmatpush2.bf16.msra.mxu1 %v1985_v47  ;;  %500 = vmatprep.subr.bf16.mxu0 %v1986_v48  ;;  %v2244_v47 = vsub.s32 0, %v2241_v43 }
  0x59   :  { %543 = vmatprep.subr.bf16.mxu1 %v1988_v50 }
  0x5a   :  { %v135_v48 = vrot.slane %v127_v45, %v2244_v47 }
  0x5b   :  { %501 = vmatpush2.bf16.msra.mxu0 %v1990_v52 }
  0x5c   :  { %544 = vmatpush2.bf16.msra.mxu1 %v1991_v53  ;;  %502 = vmatprep.subr.bf16.mxu0 %v1992_v54 }
  0x5d   :  { %545 = vmatprep.subr.bf16.mxu1 %v1994_v55 }
  0x5f   :  { %503 = vmatpush2.bf16.msra.mxu0 %v1996_v56 }
  0x60   :  { %546 = vmatpush2.bf16.msra.mxu1 %v1997_v57  ;;  %504 = vmatprep.subr.bf16.mxu0 %v1998_v58 }
  0x61   :  { %547 = vmatprep.subr.bf16.mxu1 %v2000_v59 }
  0x63   :  { %505 = vmatpush2.bf16.msra.mxu0 %v2002_v60 }
  0x64   :  { %548 = vmatpush2.bf16.msra.mxu1 %v2003_v61  ;;  %506 = vmatprep.subr.bf16.mxu0 %v2004_v62 }
  0x65   :  { %549 = vmatprep.subr.bf16.mxu1 %v2006_v63 }
  0x67   :  { %507 = vmatpush2.bf16.msra.mxu0 %v2008_v0 }
  0x68   :  { %550 = vmatpush2.bf16.msra.mxu1 %v2009_v1  ;;  %1720 = vmatprep.subr.bf16.mxu0 %v2016_v2 }
  0x69   :  { %1742 = vmatprep.subr.bf16.mxu1 %v2032_v20  ;;  %v2055_v20 = vld [vmem:[#allocation7 + $0x150] sm:$0xff]  }
  0x6a   :  { %509 = vmatmul.mubr.bf16.vlgmr.msra.gmra.mxu0 %v2229_v3 }
  0x6b   :  { %552 = vmatmul.mubr.bf16.vlgmr.msra.gmra.mxu1 %v2231_v4  ;;  %1721 = vmatpush3.bf16.msra.mxu0 %v2017_v5 }
  0x6c   :  { %1054 = vmatprep.mubr.bf16.mxu1 %v2012_v49  ;;  %1722 = vmatprep.subr.bf16.mxu0 %v2018_v6  ;;  %v131_v49 = vrot.slane %v126_v46, %v2244_v47 }
  0x6d   :  { %1743 = vmatpush3.bf16.msra.mxu1 %v2034_v22  ;;  %v2061_v22 = vld [vmem:[#allocation7 + $0x180] sm:$0xff]  }
  0x6e   :  { %1744 = vmatprep.subr.bf16.mxu1 %v2036_v23  ;;  %v2063_v23 = vld [vmem:[#allocation7 + $0x140] sm:$0xff]  }
  0x6f   :  { %1723 = vmatpush3.bf16.msra.mxu0 %v2019_v7 }
  0x70   :  { %1724 = vmatprep.subr.bf16.mxu0 %v2020_v8 }
  0x71   :  { %1745 = vmatpush3.bf16.msra.mxu1 %v2038_v24  ;;  %v2068_v24 = vld [vmem:[#allocation7 + $0x98] sm:$0xff]  }
  0x72   :  { %1746 = vmatprep.subr.bf16.mxu1 %v2040_v25  ;;  %v2069_v25 = vld [vmem:[#allocation7 + $0x90] sm:$0xff]  }
  0x73   :  { %1725 = vmatpush3.bf16.msra.mxu0 %v2021_v9  ;;  %v2035_v9 = vld [vmem:[#allocation7 + $0x178] sm:$0xff]  }
  0x74   :  { %1726 = vmatprep.subr.bf16.mxu0 %v2022_v10 }
  0x75   :  { %1747 = vmatpush3.bf16.msra.mxu1 %v2042_v26  ;;  %v2070_v26 = vld [vmem:[#allocation7 + $0x88] sm:$0xff]  }
  0x76   :  { %1748 = vmatprep.subr.bf16.mxu1 %v2044_v27  ;;  %v2071_v27 = vld [vmem:[#allocation7 + $0x80] sm:$0xff]  }
  0x77   :  { %1727 = vmatpush3.bf16.msra.mxu0 %v2023_v11  ;;  %v2037_v11 = vld [vmem:[#allocation7 + $0x1b0] sm:$0xff]  }
  0x78   :  { %1728 = vmatprep.subr.bf16.mxu0 %v2024_v12  ;;  %v2039_v12 = vld [vmem:[#allocation7 + $0x170] sm:$0xff]  }
  0x79   :  { %1749 = vmatpush3.bf16.msra.mxu1 %v2046_v28  ;;  %v2073_v28 = vld [vmem:[#allocation7 + $0x1f0] sm:$0xff]  }
  0x7a   :  { %1750 = vmatprep.subr.bf16.mxu1 %v2048_v29  ;;  %v2074_v29 = vld [vmem:[#allocation7 + $0x1e8] sm:$0xff]  }
  0x7b   :  { %1729 = vmatpush3.bf16.msra.mxu0 %v2025_v13  ;;  %v2041_v13 = vld [vmem:[#allocation7 + $0x1a8] sm:$0xff]  }
  0x7c   :  { %1730 = vmatprep.subr.bf16.mxu0 %v2026_v14  ;;  %v2043_v14 = vld [vmem:[#allocation7 + $0x168] sm:$0xff]  }
  0x7d   :  { %1751 = vmatpush3.bf16.msra.mxu1 %v2050_v30  ;;  %v2075_v30 = vld [vmem:[#allocation7 + $0x1e0] sm:$0xff]  }
  0x7e   :  { %1752 = vmatprep.subr.bf16.mxu1 %v2052_v31  ;;  %v2076_v31 = vld [vmem:[#allocation7 + $0x1d8] sm:$0xff]  }
  0x7f   :  { %1731 = vmatpush3.bf16.msra.mxu0 %v2027_v15  ;;  %v2045_v15 = vld [vmem:[#allocation7 + $0x1a0] sm:$0xff]  }
  0x80   :  { %1732 = vmatprep.subr.bf16.mxu0 %v2028_v16  ;;  %v2047_v16 = vld [vmem:[#allocation7 + $0x160] sm:$0xff]  }
  0x81   :  { %1753 = vmatpush3.bf16.msra.mxu1 %v2054_v32  ;;  %v568_v32 = vld [vmem:[#allocation7 + $0x280] sm:$0x1] }
  0x82   :  { %1754 = vmatprep.subr.bf16.mxu1 %v2056_v33  ;;  %v569_v33 = vunpack.c.l.bf16 %v568_v32 }
  0x83   :  { %1733 = vmatpush3.bf16.msra.mxu0 %v2029_v17  ;;  %v2049_v17 = vld [vmem:[#allocation7 + $0x198] sm:$0xff]  }
  0x84   :  { %1734 = vmatprep.subr.bf16.mxu0 %v2030_v18  ;;  %v2051_v18 = vld [vmem:[#allocation7 + $0x158] sm:$0xff]  }
  0x85   :  { %1755 = vmatpush3.bf16.msra.mxu1 %v2058_v34 }
  0x86   :  { %1756 = vmatprep.subr.bf16.mxu1 %v2060_v35 }
  0x87   :  { %1735 = vmatpush3.bf16.msra.mxu0 %v2031_v19  ;;  %v2053_v19 = vld [vmem:[#allocation7 + $0x190] sm:$0xff]  }
  0x88   :  { %1764 = vmatprep.subr.bf16.mxu0 %v2033_v21  ;;  %v2057_v21 = vld [vmem:[#allocation7 + $0x188] sm:$0xff]  }
  0x89   :  { %1757 = vmatpush3.bf16.msra.mxu1 %v2062_v36  ;;  %v609_v36 = vrot.slane %v569_v33, %v2244_v47  ;;  %v2079_v47 = vld [vmem:[#allocation7 + $0x1c0] sm:$0xff]  }
  0x8a   :  { %1822 = vmatprep.subr.bf16.mxu1 %v2191_v38 }
  0x8c   :  { %1055 = vmatmul.mubr.bf16.vlgmr.msra.gmra.mxu1 %v2229_v3 }
  0x8d   :  { %1823 = vmatpush3.bf16.msra.mxu1 %v2064_v37  ;;  %1838 = vmatprep.mubr.msk.bf16.mxu1 %vm2192_vm0, %v2191_v38 }
  0x8e   :  { %1824 = vmatprep.subr.bf16.mxu1 %v2191_v38 }
  0x91   :  { %1825 = vmatpush3.bf16.msra.mxu1 %v2065_v39 }
  0x92   :  { %1826 = vmatprep.subr.bf16.mxu1 %v2191_v38 }
  0x95   :  { %1827 = vmatpush3.bf16.msra.mxu1 %v2066_v40 }
  0x96   :  { %1828 = vmatprep.subr.bf16.mxu1 %v2191_v38 }
  0x99   :  { %1829 = vmatpush3.bf16.msra.mxu1 %v2067_v41 }
  0x9a   :  { %1830 = vmatprep.subr.bf16.mxu1 %v2191_v38 }
  0x9d   :  { %1831 = vmatpush3.bf16.msra.mxu1 %v2068_v24  ;;  %v2089_v24 = vld [vmem:[#allocation7 + $0x270] sm:$0xff]  }
  0x9e   :  { %1832 = vmatprep.subr.bf16.mxu1 %v2191_v38 }
  0xa1   :  { %1833 = vmatpush3.bf16.msra.mxu1 %v2069_v25  ;;  %v2090_v25 = vld [vmem:[#allocation7 + $0x268] sm:$0xff]  }
  0xa2   :  { %1834 = vmatprep.subr.bf16.mxu1 %v2191_v38 }
  0xa5   :  { %1835 = vmatpush3.bf16.msra.mxu1 %v2070_v26  ;;  %v2091_v26 = vld [vmem:[#allocation7 + $0x260] sm:$0xff]  }
  0xa6   :  { %1836 = vmatprep.subr.bf16.mxu1 %v2191_v38 }
  0xa9   :  { %1837 = vmatpush3.bf16.msra.mxu1 %v2071_v27  ;;  %v2092_v27 = vld [vmem:[#allocation7 + $0x258] sm:$0xff]  }
  0xaa   :  { %1862 = vmatprep.subr.bf16.mxu1 %v2191_v38 }
 0x12a   :  { %v510_v50 = vpop.f32.mrf.mxu0 }
 0x12b   :  { %v553_v52 = vpop.f32.mrf.mxu1  ;;  %v511_v56 = vadd.f32 %v510_v50, %v131_v49  ;;  %v2078_v50 = vld [vmem:[#allocation7 + $0x1c8] sm:$0xff]  }
 0x12c   :  { %v512_v53 = vpop.f32.mrf.mxu0 }
 0x12d   :  { %v555_v54 = vpop.f32.mrf.mxu1  ;;  %v513_v55 = vadd.f32 %v512_v53, %v135_v48  ;;  %v554_v0 = vadd.f32 %v553_v52, %v511_v56  ;;  %v2080_v52 = vld [vmem:[#allocation7 + $0x238] sm:$0xff]   ;;  %v2081_v53 = vld [vmem:[#allocation7 + $0x230] sm:$0xff]  }
 0x12e   :  { %v514_v57 = vpop.f32.mrf.mxu0  ;;  %v2084_v56 = vld [vmem:[#allocation7 + $0x218] sm:$0xff]  }
 0x12f   :  { %v557_v58 = vpop.f32.mrf.mxu1  ;;  %v515_v59 = vadd.f32 %v514_v57, %v131_v49  ;;  %v556_v61 = vadd.f32 %v555_v54, %v513_v55  ;;  %v562_v7 = vmax.f32 %v554_v0, 0.0  ;;  %v2077_v49 = vld [vmem:[#allocation7 + $0x1d0] sm:$0xff]   ;;  %v2082_v54 = vld [vmem:[#allocation7 + $0x228] sm:$0xff]   ;;  %v2083_v55 = vld [vmem:[#allocation7 + $0x220] sm:$0xff]  }
 0x130   :  { %v516_v60 = vpop.f32.mrf.mxu0 }
 0x131   :  { %v558_v62 = vadd.f32 %v557_v58, %v515_v59  ;;  %v517_v63 = vadd.f32 %v516_v60, %v135_v48  ;;  %v559_v1 = vpop.f32.mrf.mxu1  ;;  %v563_v5 = vmax.f32 %v556_v61, 0.0 }
 0x133   :  { %v560_v2 = vadd.f32 %v559_v1, %v517_v63  ;;  %v564_v3 = vmax.f32 %v558_v62, 0.0 }
 0x135   :  { %v565_v6 = vmax.f32 %v560_v2, 0.0  ;;  %v566_v10 = vpack.c.bf16 %v564_v3, %v562_v7  ;;  %v1195_v3 = vsub.s32 1, %v2241_v43 }
 0x137   :  { %v567_v8 = vpack.c.bf16 %v565_v6, %v563_v5 }
 0x139   :  { %738 = vmatprep.mubr.bf16.mxu0 %v567_v8 }
 0x13a   :  { %739 = vmatmul.mubr.bf16.vlgmr.msra.gmra.mxu0 %v566_v10  ;;  %v1196_v10 = vrot.slane %v569_v33, %v1195_v3 }
 0x13b   :  { %1765 = vmatpush3.bf16.msra.mxu0 %v2035_v9  ;;  %1095 = vmatprep.mubr.bf16.mxu0 %v2226_v51  ;;  %v2059_v51 = vld [vmem:[#allocation7 + $0x148] sm:$0xff]  }
 0x13c   :  { %1766 = vmatprep.subr.bf16.mxu0 %v2037_v11 }
 0x13f   :  { %1767 = vmatpush3.bf16.msra.mxu0 %v2039_v12 }
 0x140   :  { %1768 = vmatprep.subr.bf16.mxu0 %v2041_v13 }
 0x143   :  { %1769 = vmatpush3.bf16.msra.mxu0 %v2043_v14 }
 0x144   :  { %1770 = vmatprep.subr.bf16.mxu0 %v2045_v15 }
 0x147   :  { %1771 = vmatpush3.bf16.msra.mxu0 %v2047_v16 }
 0x148   :  { %1772 = vmatprep.subr.bf16.mxu0 %v2049_v17 }
 0x14b   :  { %1773 = vmatpush3.bf16.msra.mxu0 %v2051_v18 }
 0x14c   :  { %1774 = vmatprep.subr.bf16.mxu0 %v2053_v19  ;;  %v1758_v57 = vpop.f32.mrf.mxu1 }
 0x14e   :  { %v1759_v59 = vpop.f32.mrf.mxu1 }
 0x14f   :  { %1775 = vmatpush3.bf16.msra.mxu0 %v2055_v20  ;;  %v1760_v63 = vadd.f32 %v1759_v59, %v1758_v57  ;;  %v572_v57 = vld [vmem:[#allocation7 + $0x280] sm:$0x4]  ;;  %v1444_v59 = vsub.s32 4, %v2241_v43 }
 0x150   :  { %1776 = vmatprep.subr.bf16.mxu0 %v2057_v21  ;;  %v1761_v61 = vpop.f32.mrf.mxu1  ;;  %v2085_v21 = vld [vmem:[#allocation7 + $0x210] sm:$0xff]  }
 0x152   :  { %v1762_v1 = vpop.f32.mrf.mxu1 }
 0x153   :  { %1777 = vmatpush3.bf16.msra.mxu0 %v2059_v51  ;;  %v1763_v5 = vadd.f32 %v1762_v1, %v1761_v61  ;;  %v2086_v51 = vld [vmem:[#allocation7 + $0x208] sm:$0xff]  }
 0x154   :  { %1778 = vmatprep.subr.bf16.mxu0 %v2061_v22  ;;  %v2087_v22 = vld [vmem:[#allocation7 + $0x200] sm:$0xff]  }
 0x157   :  { %1779 = vmatpush3.bf16.msra.mxu0 %v2063_v23  ;;  %v2088_v23 = vld [vmem:[#allocation7 + $0x278] sm:$0xff]  }
 0x158   :  { %1842 = vmatprep.subr.bf16.mxu0 %v2191_v38 }
 0x15a   :  { %1096 = vmatmul.mubr.bf16.vlgmr.msra.gmra.mxu0 %v2231_v4  ;;  %v2072_v4 = vld [vmem:[#allocation7 + $0x1f8] sm:$0xff]  }
 0x15b   :  { %1858 = vmatprep.mubr.msk.bf16.mxu0 %vm2192_vm0, %v2191_v38  ;;  %1843 = vmatpush3.bf16.msra.mxu0 %v2072_v4  ;;  %v570_v4 = vld [vmem:[#allocation7 + $0x280] sm:$0x2] }
 0x15c   :  { %1844 = vmatprep.subr.bf16.mxu0 %v2191_v38 }
 0x15f   :  { %1845 = vmatpush3.bf16.msra.mxu0 %v2073_v28  ;;  %v571_v28 = vunpack.c.l.bf16 %v570_v4 }
 0x160   :  { %1846 = vmatprep.subr.bf16.mxu0 %v2191_v38 }
 0x163   :  { %1847 = vmatpush3.bf16.msra.mxu0 %v2074_v29  ;;  %v1220_v29 = vsub.s32 2, %v2241_v43 }
 0x164   :  { %1848 = vmatprep.subr.bf16.mxu0 %v2191_v38 }
 0x167   :  { %1849 = vmatpush3.bf16.msra.mxu0 %v2075_v30  ;;  %v1221_v30 = vrot.slane %v571_v28, %v1220_v29 }
 0x168   :  { %1850 = vmatprep.subr.bf16.mxu0 %v2191_v38 }
 0x16b   :  { %1851 = vmatpush3.bf16.msra.mxu0 %v2076_v31 }
 0x16c   :  { %1852 = vmatprep.subr.bf16.mxu0 %v2191_v38 }
 0x16f   :  { %1853 = vmatpush3.bf16.msra.mxu0 %v2077_v49 }
 0x170   :  { %1854 = vmatprep.subr.bf16.mxu0 %v2191_v38 }
 0x173   :  { %1855 = vmatpush3.bf16.msra.mxu0 %v2078_v50 }
 0x174   :  { %1856 = vmatprep.subr.bf16.mxu0 %v2191_v38 }
 0x177   :  { %1857 = vmatpush3.bf16.msra.mxu0 %v2079_v47 }
 0x178   :  { %1882 = vmatprep.subr.bf16.mxu0 %v2191_v38 }
 0x1fa   :  { %v1736_v34 = vpop.f32.mrf.mxu0 }
 0x1fc   :  { %v1737_v35 = vpop.f32.mrf.mxu0 }
 0x1fd   :  { %v1738_v37 = vadd.f32 %v1737_v35, %v1736_v34 }
 0x1fe   :  { %v1739_v39 = vpop.f32.mrf.mxu0 }
 0x1ff   :  { %v741_v41 = vadd.f32 %v1738_v37, %v609_v36 }
 0x200   :  { %v1740_v40 = vpop.f32.mrf.mxu0 }
 0x201   :  { %v1741_v42 = vadd.f32 %v1740_v40, %v1739_v39  ;;  %v747_v45 = vmax.f32 %v741_v41, 0.0  ;;  %v2093_v41 = vld [vmem:[#allocation7 + $0x250] sm:$0xff]  }
 0x203   :  { %v744_v44 = vadd.f32 %v1741_v42, %v609_v36  ;;  %v2094_v42 = vld [vmem:[#allocation7 + $0x248] sm:$0xff]  }
 0x205   :  { %v748_v46 = vmax.f32 %v744_v44, 0.0  ;;  %v2095_v44 = vld [vmem:[#allocation7 + $0x240] sm:$0xff]  }
 0x207   :  { %v749_v48 = vpack.c.bf16 %v748_v46, %v747_v45  ;;  %v1332_v45 = vsub.s32 3, %v2241_v43 }
 0x209   :  { %1839 = vmatmul.mubr.bf16.vlgmr.msra.gmra.mxu1 %v749_v48  ;;  %v1333_v46 = vrot.slane %v571_v28, %v1332_v45 }
 0x20a   :  { %1878 = vmatprep.mubr.msk.bf16.mxu1 %vm2192_vm0, %v2191_v38  ;;  %1863 = vmatpush3.bf16.msra.mxu1 %v2080_v52 }
 0x20b   :  { %1864 = vmatprep.subr.bf16.mxu1 %v2191_v38 }
 0x20e   :  { %1865 = vmatpush3.bf16.msra.mxu1 %v2081_v53 }
 0x20f   :  { %1866 = vmatprep.subr.bf16.mxu1 %v2191_v38 }
 0x212   :  { %1867 = vmatpush3.bf16.msra.mxu1 %v2082_v54 }
 0x213   :  { %1868 = vmatprep.subr.bf16.mxu1 %v2191_v38 }
 0x216   :  { %1869 = vmatpush3.bf16.msra.mxu1 %v2083_v55 }
 0x217   :  { %1870 = vmatprep.subr.bf16.mxu1 %v2191_v38 }
 0x21a   :  { %1871 = vmatpush3.bf16.msra.mxu1 %v2084_v56  ;;  %v1780_v58 = vpop.f32.mrf.mxu0 }
 0x21b   :  { %1872 = vmatprep.subr.bf16.mxu1 %v2191_v38 }
 0x21c   :  { %v1781_v60 = vpop.f32.mrf.mxu0 }
 0x21d   :  { %v1782_v0 = vadd.f32 %v1781_v60, %v1780_v58  ;;  %v573_v58 = vunpack.c.l.bf16 %v572_v57 }
 0x21e   :  { %v1783_v62 = vpop.f32.mrf.mxu0  ;;  %1873 = vmatpush3.bf16.msra.mxu1 %v2085_v21 }
 0x21f   :  { %v1098_v7 = vadd.f32 %v1782_v0, %v1760_v63  ;;  %1874 = vmatprep.subr.bf16.mxu1 %v2191_v38  ;;  %v1445_v60 = vrot.slane %v573_v58, %v1444_v59 }
 0x220   :  { %v1784_v2 = vpop.f32.mrf.mxu0 }
 0x221   :  { %v1785_v6 = vadd.f32 %v1784_v2, %v1783_v62 }
 0x222   :  { %1875 = vmatpush3.bf16.msra.mxu1 %v2086_v51 }
 0x223   :  { %v1101_v12 = vadd.f32 %v1785_v6, %v1763_v5  ;;  %1876 = vmatprep.subr.bf16.mxu1 %v2191_v38 }
 0x226   :  { %1877 = vmatpush3.bf16.msra.mxu1 %v2087_v22 }
 0x2c9   :  { %v1186_v8 = vpop.f32.mrf.mxu1 }
 0x2ca   :  { %v1187_v9 = vadd.f32 %v1186_v8, %v1098_v7 }
 0x2cb   :  { %v1840_v11 = vpop.f32.mrf.mxu1 }
 0x2cc   :  { %v1197_v14 = vadd.f32 %v1196_v10, %v1187_v9 }
 0x2cd   :  { %v1189_v13 = vpop.f32.mrf.mxu1 }
 0x2ce   :  { %v1190_v15 = vadd.f32 %v1189_v13, %v1101_v12  ;;  %v1199_v18 = vmax.f32 %v1197_v14, 0.0 }
 0x2cf   :  { %v1841_v16 = vpop.f32.mrf.mxu1 }
 0x2d0   :  { %v1198_v17 = vadd.f32 %v1196_v10, %v1190_v15 }
 0x2d2   :  { %v1200_v19 = vmax.f32 %v1198_v17, 0.0 }
 0x2d4   :  { %v1201_v20 = vpack.c.bf16 %v1200_v19, %v1199_v18 }
 0x2d6   :  { %1859 = vmatmul.mubr.bf16.vlgmr.msra.gmra.mxu0 %v1201_v20 }
 0x2d7   :  { %1898 = vmatprep.mubr.msk.bf16.mxu0 %vm2192_vm0, %v2191_v38  ;;  %1883 = vmatpush3.bf16.msra.mxu0 %v2088_v23 }
 0x2d8   :  { %1884 = vmatprep.subr.bf16.mxu0 %v2191_v38 }
 0x2db   :  { %1885 = vmatpush3.bf16.msra.mxu0 %v2089_v24 }
 0x2dc   :  { %1886 = vmatprep.subr.bf16.mxu0 %v2191_v38 }
 0x2df   :  { %1887 = vmatpush3.bf16.msra.mxu0 %v2090_v25 }
 0x2e0   :  { %1888 = vmatprep.subr.bf16.mxu0 %v2191_v38 }
 0x2e3   :  { %1889 = vmatpush3.bf16.msra.mxu0 %v2091_v26 }
 0x2e4   :  { %1890 = vmatprep.subr.bf16.mxu0 %v2191_v38 }
 0x2e7   :  { %1891 = vmatpush3.bf16.msra.mxu0 %v2092_v27 }
 0x2e8   :  { %1892 = vmatprep.subr.bf16.mxu0 %v2191_v38 }
 0x2eb   :  { %1893 = vmatpush3.bf16.msra.mxu0 %v2093_v41 }
 0x2ec   :  { %1894 = vmatprep.subr.bf16.mxu0 %v2191_v38 }
 0x2ef   :  { %1895 = vmatpush3.bf16.msra.mxu0 %v2094_v42 }
 0x2f0   :  { %1896 = vmatprep.subr.bf16.mxu0 %v2191_v38 }
 0x2f3   :  { %1897 = vmatpush3.bf16.msra.mxu0 %v2095_v44 }
 0x396   :  { %v1304_v31 = vpop.f32.mrf.mxu0 }
 0x397   :  { %v1305_v33 = vadd.f32 %v1304_v31, %v1221_v30 }
 0x398   :  { %v1860_v32 = vpop.f32.mrf.mxu0 }
 0x399   :  { %v1311_v37 = vmax.f32 %v1305_v33, 0.0 }
 0x39a   :  { %v1307_v34 = vpop.f32.mrf.mxu0 }
 0x39b   :  { %v1308_v35 = vadd.f32 %v1307_v34, %v1221_v30 }
 0x39c   :  { %v1861_v36 = vpop.f32.mrf.mxu0 }
 0x39d   :  { %v1312_v39 = vmax.f32 %v1308_v35, 0.0 }
 0x39f   :  { %v1313_v40 = vpack.c.bf16 %v1312_v39, %v1311_v37 }
 0x3a1   :  { %1879 = vmatmul.mubr.bf16.vlgmr.msra.gmra.mxu1 %v1313_v40 }
 0x461   :  { %v1416_v48 = vpop.f32.mrf.mxu1 }
 0x462   :  { %v1417_v50 = vadd.f32 %v1416_v48, %v1333_v46 }
 0x463   :  { %v1880_v49 = vpop.f32.mrf.mxu1 }
 0x464   :  { %v1423_v54 = vmax.f32 %v1417_v50, 0.0 }
 0x465   :  { %v1419_v47 = vpop.f32.mrf.mxu1 }
 0x466   :  { %v1420_v52 = vadd.f32 %v1419_v47, %v1333_v46 }
 0x467   :  { %v1881_v53 = vpop.f32.mrf.mxu1 }
 0x468   :  { %v1424_v55 = vmax.f32 %v1420_v52, 0.0 }
 0x46a   :  { %v1425_v56 = vpack.c.bf16 %v1424_v55, %v1423_v54 }
 0x46c   :  { %1899 = vmatmul.mubr.bf16.vlgmr.msra.gmra.mxu0 %v1425_v56 }
 0x52c   :  { %v1528_v38 = vpop.f32.mrf.mxu0 }
 0x52d   :  { %v1529_v63 = vadd.f32 %v1528_v38, %v1445_v60 }
 0x52e   :  { %v1900_v61 = vpop.f32.mrf.mxu0 }
 0x530   :  { %v1531_v62 = vpop.f32.mrf.mxu0 }
 0x531   :  { %v1532_v0 = vadd.f32 %v1531_v62, %v1445_v60 }
 0x532   :  { %v1901_v1 = vpop.f32.mrf.mxu0 }
 0x533   :  { %v1718_v2 = vpack.c.bf16 %v1532_v0, %v1529_v63 }
 0x535   :  { %1719 = vst [vmem:[#allocation8] sm:$0xff] %v1718_v2  }
 0x536   :  { %2167 = shalt.err (!%p2164_p5)
}
 0x537   :  { %1556 = dma.vmem_to_hbm [thread:$0]  %s1551_s2, 128, %s2299_s3, [#allocation4], %s2189_s28, %s2189_s28, %s2190_s29  }
 0x538   :  { %2180 = dma.done.wait [#allocation4], 128  }
 0x539   :  { %2181 = vsyncadd [#allocation4], 4294967168 }
 0x53a   :  { %1560 = vsyncpa [#allocation3], 1 }
 0x53b   :  { %1561 = vsyncpa [#allocation6], 1 }
 0x53c   :  { %1562 = vsyncpa [#allocation4], 1 }

</bundles_post_ra>
